<compile_context>
chip_gen: v7x
topology: tpu7x:2x2x1
jax: 0.10.0
libtpu: 0.0.40
codegen_flags: <defaults>
</compile_context>

<pallas_src>
import functools

import jax
import jax.numpy as jnp
from jax.experimental import pallas as pl
from jax.experimental.pallas import tpu as pltpu


def head_kernel(x_ref, w_ref, b_ref, out_ref, pooled_ref, acc_ref, *, s_total):
    # x_ref:     [n_blk, C, s_blk]   (native layout tile, S on lanes)
    # w_ref:     [C, K]              (transpose of nn.Linear weight)
    # b_ref:     [1, K]
    # out_ref:   [n_blk, K]          softmax probabilities
    # pooled_ref:[n_blk, C]          global-average-pooled features
    # acc_ref:   [n_blk, C] f32      VMEM accumulator, persists across S steps
    s = pl.program_id(1)

    @pl.when(s == 0)
    def _():
        acc_ref[...] = jnp.zeros_like(acc_ref)

    # Partial sum over the spatio-temporal tile; accumulate in f32.
    acc_ref[...] += jnp.sum(x_ref[...].astype(jnp.float32), axis=-1)

    @pl.when(s == pl.num_programs(1) - 1)
    def _():
        # Mean normalization applied once at finalize (AdaptiveAvgPool3d(1)).
        pooled = acc_ref[...] * (1.0 / s_total)                      # [n_blk, C]
        pooled_ref[...] = pooled.astype(pooled_ref.dtype)

        # Linear layer on the MXU.
        logits = jnp.dot(pooled, w_ref[...].astype(jnp.float32),
                         preferred_element_type=jnp.float32)         # [n_blk, K]
        logits = logits + b_ref[...].astype(jnp.float32)

        # Numerically stable softmax; exact divide (tiny epilogue tensor, so
        # the precision win over the approx EUP reciprocal is free).
        m = jnp.max(logits, axis=-1, keepdims=True)
        e = jnp.exp(logits - m)
        denom = jnp.sum(e, axis=-1, keepdims=True)
        out_ref[...] = (e / denom).astype(out_ref.dtype)


def _pick_s_tile(S, n_blk, C, itemsize, per_buffer_budget=8 << 20):
    """Largest S tile (multiple of 128, dividing S) whose input block stays
    under the per-double-buffer byte budget (v7x-safe)."""
    for cand in (1024, 512, 256, 128):
        if S % cand == 0 and n_blk * C * cand * itemsize <= per_buffer_budget:
            return cand
    return S  # fall back: single full-S block (still satisfies (8,128) rule)


def base_video_model_forward(x, w, b):
    """x: [N, C, T, H, W] (NCDHW, PyTorch convention).
       w: [C, K]  (transpose of nn.Linear weight), b: [K]."""
    N, C, T, H, W = x.shape
    S = T * H * W
    K = w.shape[1]

    # Native layout: collapse (T, H, W) -> S. Pure reshape, no HBM transpose,
    # and no dtype upcast in the wrapper (kernel casts per-tile).
    x_flat = x.reshape(N, C, S)
    b2d = b.reshape(1, K)

    n_blk = 8 if N >= 8 else N                 # full-N or multiple-of-8 sublane tile
    s_blk = _pick_s_tile(S, n_blk, C, x_flat.dtype.itemsize)
    grid = (pl.cdiv(N, n_blk), pl.cdiv(S, s_blk))

    kernel = functools.partial(head_kernel, s_total=float(S))

    out, pooled = pl.pallas_call(
        kernel,
        out_shape=(
            jax.ShapeDtypeStruct((N, K), jnp.float32),
            jax.ShapeDtypeStruct((N, C), jnp.float32),
        ),
        grid_spec=pltpu.PrefetchScalarGridSpec(
            num_scalar_prefetch=0,
            grid=grid,
            in_specs=[
                pl.BlockSpec((n_blk, C, s_blk), lambda n, s: (n, 0, s)),
                pl.BlockSpec((C, K), lambda n, s: (0, 0)),
                pl.BlockSpec((1, K), lambda n, s: (0, 0)),
            ],
            out_specs=(
                pl.BlockSpec((n_blk, K), lambda n, s: (n, 0)),
                pl.BlockSpec((n_blk, C), lambda n, s: (n, 0)),
            ),
            scratch_shapes=[pltpu.VMEM((n_blk, C), jnp.float32)],
        ),
        compiler_params=pltpu.CompilerParams(
            dimension_semantics=("parallel", "arbitrary"),
            vmem_limit_bytes=32 << 20,
        ),
    )(x_flat, w, b2d)
    return out, pooled


def reference_forward(x, w, b):
    """Pure-JAX reference of the same head for verification."""
    pooled = jnp.mean(x.astype(jnp.float32), axis=(2, 3, 4))          # [N, C]
    logits = pooled @ w.astype(jnp.float32) + b.astype(jnp.float32)
    out = jax.nn.softmax(logits, axis=-1)
    return out, pooled


if __name__ == "__main__":
    # Small shapes consistent with the module:
    #   N=2 clips, dim (NUM_OUT_FEATURES) C=32, T=8, H=W=16, NUM_CLASSES=16.
    # S = 2048 -> two pipelined S steps with the chosen 1024-row tile.
    N, C, T, H, W = 2, 32, 8, 16, 16
    K = 16

    key = jax.random.PRNGKey(0)
    kx, kw, kb = jax.random.split(key, 3)
    x = jax.random.normal(kx, (N, C, T, H, W), dtype=jnp.float32)
    # nn.Linear(dim, num_classes): weight [K, C]; we store the transpose [C, K].
    w = jax.random.normal(kw, (C, K), dtype=jnp.float32) * (1.0 / jnp.sqrt(C))
    b = jax.random.normal(kb, (K,), dtype=jnp.float32) * 0.01

    out, pooled = base_video_model_forward(x, w, b)
    out = jax.block_until_ready(out)
    pooled = jax.block_until_ready(pooled)

    out_ref, pooled_ref = reference_forward(x, w, b)
    assert out.shape == (N, K) and pooled.shape == (N, C)
    assert jnp.allclose(pooled, pooled_ref, atol=1e-5, rtol=1e-5)
    assert jnp.allclose(out, out_ref, atol=1e-5, rtol=1e-5)
    assert jnp.allclose(jnp.sum(out, axis=-1), 1.0, atol=1e-5)

    print("KERNEL_OK")
</pallas_src>

<mosaic_0001>
module attributes {stable_mosaic.version = 11 : i64} {
  func.func @head_kernel(%arg0: i32, %arg1: i32, %arg2: memref<2x32x1024xf32, #tpu.memory_space<vmem>>, %arg3: memref<32x16xf32, #tpu.memory_space<vmem>>, %arg4: memref<1x16xf32, #tpu.memory_space<vmem>>, %arg5: memref<2x16xf32, #tpu.memory_space<vmem>>, %arg6: memref<2x32xf32, #tpu.memory_space<vmem>>, %arg7: memref<2x32xf32, #tpu.memory_space<vmem>>) attributes {dimension_semantics = [#tpu.dimension_semantics<parallel>, #tpu.dimension_semantics<arbitrary>], iteration_bounds = array<i64: 1, 2>, scalar_prefetch = 0 : i64, scratch_operands = 1 : i64, tpu.core_type = #tpu.core_type<tc>, window_params = [{transform_indices = @transform_0, window_bounds = array<i64: 2, 32, 1024>}, {pipeline_mode = #tpu.pipeline_mode<synchronous>, transform_indices = @transform_1, window_bounds = array<i64: 32, 16>}, {pipeline_mode = #tpu.pipeline_mode<synchronous>, transform_indices = @transform_2, window_bounds = array<i64: 1, 16>}, {transform_indices = @transform_3, window_bounds = array<i64: 2, 16>}, {transform_indices = @transform_4, window_bounds = array<i64: 2, 32>}]} {
    %c0_i32 = arith.constant 0 : i32
    %0 = arith.cmpi eq, %arg1, %c0_i32 : i32
    %1 = arith.extui %0 : i1 to i32
    %c0_i32_0 = arith.constant 0 : i32
    %2 = arith.cmpi ne, %1, %c0_i32_0 : i32
    scf.if %2 {
      %cst_8 = arith.constant 0.000000e+00 : f32
      %11 = vector.broadcast %cst_8 : f32 to vector<2x32xf32>
      %c0_9 = arith.constant 0 : index
      %c0_10 = arith.constant 0 : index
      %12 = vector.load %arg7[%c0_9, %c0_10] : memref<2x32xf32, #tpu.memory_space<vmem>>, vector<2x32xf32>
      tpu.vector_store %arg7[%c0_9, %c0_10], %11 {strides = array<i32>} : memref<2x32xf32, #tpu.memory_space<vmem>>, vector<2x32xf32>,
    } else {
    }
    %c0 = arith.constant 0 : index
    %c0_1 = arith.constant 0 : index
    %3 = vector.load %arg7[%c0, %c0_1] : memref<2x32xf32, #tpu.memory_space<vmem>>, vector<2x32xf32>
    %c0_2 = arith.constant 0 : index
    %c0_3 = arith.constant 0 : index
    %c0_4 = arith.constant 0 : index
    %4 = vector.load %arg2[%c0_2, %c0_3, %c0_4] : memref<2x32x1024xf32, #tpu.memory_space<vmem>>, vector<2x32x1024xf32>
    %cst = arith.constant dense<0.000000e+00> : vector<2x32xf32>
    %5 = vector.multi_reduction <add>, %4, %cst [2] : vector<2x32x1024xf32> to vector<2x32xf32>
    %6 = arith.addf %3, %5 : vector<2x32xf32>
    %c0_5 = arith.constant 0 : index
    %c0_6 = arith.constant 0 : index
    %7 = vector.load %arg7[%c0_5, %c0_6] : memref<2x32xf32, #tpu.memory_space<vmem>>, vector<2x32xf32>
    tpu.vector_store %arg7[%c0_5, %c0_6], %6 {strides = array<i32>} : memref<2x32xf32, #tpu.memory_space<vmem>>, vector<2x32xf32>,
    %c1_i32 = arith.constant 1 : i32
    %8 = arith.cmpi eq, %arg1, %c1_i32 : i32
    %9 = arith.extui %8 : i1 to i32
    %c0_i32_7 = arith.constant 0 : i32
    %10 = arith.cmpi ne, %9, %c0_i32_7 : i32
    scf.if %10 {
      %c0_8 = arith.constant 0 : index
      %c0_9 = arith.constant 0 : index
      %11 = vector.load %arg7[%c0_8, %c0_9] : memref<2x32xf32, #tpu.memory_space<vmem>>, vector<2x32xf32>
      %cst_10 = arith.constant 4.8828125E-4 : f32
      %12 = vector.broadcast %cst_10 : f32 to vector<2x32xf32>
      %13 = arith.mulf %11, %12 : vector<2x32xf32>
      %c0_11 = arith.constant 0 : index
      %c0_12 = arith.constant 0 : index
      %14 = vector.load %arg6[%c0_11, %c0_12] : memref<2x32xf32, #tpu.memory_space<vmem>>, vector<2x32xf32>
      tpu.vector_store %arg6[%c0_11, %c0_12], %13 {strides = array<i32>} : memref<2x32xf32, #tpu.memory_space<vmem>>, vector<2x32xf32>,
      %c0_13 = arith.constant 0 : index
      %c0_14 = arith.constant 0 : index
      %15 = vector.load %arg3[%c0_13, %c0_14] : memref<32x16xf32, #tpu.memory_space<vmem>>, vector<32x16xf32>
      %cst_15 = arith.constant dense<0.000000e+00> : vector<2x16xf32>
      %16 = tpu.matmul %13, %15, %cst_15 {dimension_numbers = #tpu.dot_dimension_numbers<[1], [0], [0], [1], [0, 0, 1, 1], [], []>} : vector<2x32xf32>, vector<32x16xf32>, vector<2x16xf32> -> vector<2x16xf32>
      %c0_16 = arith.constant 0 : index
      %c0_17 = arith.constant 0 : index
      %17 = vector.load %arg4[%c0_16, %c0_17] : memref<1x16xf32, #tpu.memory_space<vmem>>, vector<1x16xf32>
      %18 = vector.broadcast %17 : vector<1x16xf32> to vector<2x16xf32>
      %19 = arith.addf %16, %18 : vector<2x16xf32>
      %cst_18 = arith.constant dense<0xFF800000> : vector<2xf32>
      %20 = vector.multi_reduction <maximumf>, %19, %cst_18 [1] : vector<2x16xf32> to vector<2xf32>
      %21 = vector.shape_cast %20 : vector<2xf32> to vector<2x1xf32>
      %22 = vector.broadcast %21 : vector<2x1xf32> to vector<2x16xf32>
      %23 = arith.subf %19, %22 : vector<2x16xf32>
      %24 = math.exp %23 : vector<2x16xf32>
      %cst_19 = arith.constant dense<0.000000e+00> : vector<2xf32>
      %25 = vector.multi_reduction <add>, %24, %cst_19 [1] : vector<2x16xf32> to vector<2xf32>
      %26 = vector.shape_cast %25 : vector<2xf32> to vector<2x1xf32>
      %27 = vector.broadcast %26 : vector<2x1xf32> to vector<2x16xf32>
      %28 = arith.divf %24, %27 : vector<2x16xf32>
      %c0_20 = arith.constant 0 : index
      %c0_21 = arith.constant 0 : index
      %29 = vector.load %arg5[%c0_20, %c0_21] : memref<2x16xf32, #tpu.memory_space<vmem>>, vector<2x16xf32>
      tpu.vector_store %arg5[%c0_20, %c0_21], %28 {strides = array<i32>} : memref<2x16xf32, #tpu.memory_space<vmem>>, vector<2x16xf32>,
    } else {
    }
    return
  }
  func.func @transform_0(%arg0: i32, %arg1: i32) -> (i32, i32, i32) {
    %c0_i32 = arith.constant 0 : i32
    %c0_i32_0 = arith.constant 0 : i32
    return %arg0, %c0_i32, %arg1 : i32, i32, i32
  }
  func.func @transform_1(%arg0: i32, %arg1: i32) -> (i32, i32) {
    %c0_i32 = arith.constant 0 : i32
    %c0_i32_0 = arith.constant 0 : i32
    %c0_i32_1 = arith.constant 0 : i32
    return %c0_i32, %c0_i32_0 : i32, i32
  }
  func.func @transform_2(%arg0: i32, %arg1: i32) -> (i32, i32) {
    %c0_i32 = arith.constant 0 : i32
    %c0_i32_0 = arith.constant 0 : i32
    %c0_i32_1 = arith.constant 0 : i32
    return %c0_i32, %c0_i32_0 : i32, i32
  }
  func.func @transform_3(%arg0: i32, %arg1: i32) -> (i32, i32) {
    %c0_i32 = arith.constant 0 : i32
    %c0_i32_0 = arith.constant 0 : i32
    return %arg0, %c0_i32 : i32, i32
  }
  func.func @transform_4(%arg0: i32, %arg1: i32) -> (i32, i32) {
    %c0_i32 = arith.constant 0 : i32
    %c0_i32_0 = arith.constant 0 : i32
    return %arg0, %c0_i32 : i32, i32
  }
}

</mosaic_0001>

<bundles_post_ra>
// kernel: tpu_custom_call.1
= control target key start
LH: loop header
LB: loop body
LE: loop exit
PB: predicated region body
PF: predicated region fallthrough
CT: control target
= control target key end

     0   :  { %10 = vsyncpa [#allocation4], 0  ;;  %s1205_s0 = inlined_call_operand.hbm [shape: f32[2,32,2048], index: 0, kind: input, shape index: {}]   ;;  %s1206_s1 = inlined_call_operand.vmem [shape: f32[32,16], index: 1, kind: input, shape index: {}]   ;;  %s1207_s2 = inlined_call_operand.vmem [shape: f32[1,16], index: 2, kind: input, shape index: {}]   ;;  %s1208_s3 = inlined_call_operand.hbm [shape: f32[2,16], index: 3, kind: output, shape index: {0}]   ;;  %s1209_s4 = inlined_call_operand.hbm [shape: f32[2,32], index: 4, kind: output, shape index: {1}]  }
   0x1   :  { %12 = vsyncpa [#allocation4 + $0x1], 0 }
   0x2   :  { %13 = vsyncpa [#allocation5], 0 }
   0x3   :  { %14 = vsyncpa [#allocation8], 0  ;;  %s937_s15 = smov 0   ;;  %s939_s16 = smov 0  }
   0x4   :  { %s941_s17 = smov 0   ;;  %s943_s18 = smov 0  }
   0x5   :  { %s945_s19 = smov 0   ;;  %s947_s20 = smov 0  }
   0x6 LB: > { %s639_s21 = sadd.s32 4294967295, %s900_s20   ;;  %s29_s22 = sadd.s32 1, %s896_s19  ;;  %s900_s20 = sphi %s947_s20, %s20_s20   ;;  %s896_s19 = sphi %s945_s19, %s1219_s19   ;;  %s892_s18 = sphi %s943_s18, %s1218_s18   ;;  %s888_s17 = sphi %s941_s17, %s1217_s17   ;;  %s884_s16 = sphi %s939_s16, %s1216_s16   ;;  %s880_s15 = sphi %s937_s15, %s1215_s15  }
   0x7   : > { %p30_p0 = scmp.ge.s32.totalorder %s29_s22, 2  ;;  %s41_s23 = sadd.s32 1, %s888_s17 }
   0x8   : > { %p48_p1 = scmp.ne.s32.totalorder %s888_s17, %s884_s16  ;;  %p49_p2 = scmp.eq.s32.totalorder %s900_s20, 0 }
   0x9   : > { %s1221_s22 = smov (%p30_p0, %s29_s22), 0  ;;  %p54_p4 = scmp.ne.s32.totalorder %s884_s16, %s880_s15 }
   0xa   : > { %p973_p3 = por %p49_p2, %p48_p1  ;;  %s37_s25 = ssub.s32 %s896_s19, %s1221_s22 }
   0xb   : > { %p55_p5 = scmp.eq.s32.totalorder %s639_s21, 0  ;;  %p39_p6 = scmp.eq.s32.totalorder %s37_s25, 0 }
   0xc   : > { %p694_p8 = scmp.lt.s32.totalorder %s900_s20, 2  ;;  %s178_s28 = sand.u32 1, %s888_s17  }
   0xd   : > { %p982_p7 = por %p55_p5, %p54_p4  ;;  %s657_s29 = sshll.u32 %s896_s19, 10 }
   0xe   : > { %s988_s27 = scalar_select %p39_p6, %s888_s17, %s41_s23  }
   0xf   : > { %s642_s30 = sshll.u32 %s178_s28, 9  ;;  %s995_s7 = scalar_lea.hbm %s1205_s0, %s657_s29 }
  0x10   : > { %s182_s8 = scalar_lea.vmem [#allocation3], %s642_s30  ;;  %p999_p9 = pnand %p694_p8, %p973_p3 }
  0x11   : > { %s192_s9 = sshll.u32 %s182_s8, 4  ;;  %s1006_s11 = scalar_lea.sflag [#allocation4], %s178_s28  ;;  %s1003_s9 = int_to_ptr.vmem [resolvable:$true] %s192_s9 }
  0x12   : > { %s760_s12 = scalar_lea.hbm %s995_s7, 8192  ;;  %p762_p12 = pneg %p999_p9 }
  0x13   : > { %p761_p11 = scmp.ne.s32.totalorder %s995_s7, %s760_s12  ;;  %s765_s15 = scalar_lea.hbm %s1205_s0, 16384 }
  0x14   : > { %p766_p1 = scmp.lt.u32.totalorder %s995_s7, %s1205_s0  ;;  %p767_p2 = scmp.lt.u32.totalorder %s765_s15, %s760_s12 }
  0x15   : > { %p763_p13 = pnand %p762_p12, %p761_p11  ;;  %p769_p4 = scmp.lt.u32.totalorder %s760_s12, %s995_s7 }
  0x16   : > { %p768_p3 = por %p767_p2, %p766_p1 }
  0x17   : > { %p764_p0 = pneg %p763_p13 }
  0x18   : > { %p770_p5 = por %p769_p4, %p768_p3 }
  0x1a   : > { %p771_p6 = pnand %p770_p5, %p764_p0 }
  0x1c   : > { %774 = shalt.err (!%p771_p6)
}
  0x1d   : > { %s775_s25 = scalar_lea.vmem %s1003_s9, 8192  ;;  %s902_s28 = smov [#allocation3]  }
  0x1e   : > { %p776_p8 = scmp.ne.s32.totalorder %s1003_s9, %s775_s25  ;;  %s780_s29 = sshll.u32 %s902_s28, 4  ;;  %s781_s29 = int_to_ptr.vmem [resolvable:$false] %s780_s29 }
  0x1f   : > { %s782_s30 = scalar_lea.vmem %s781_s29, 16384  ;;  %p783_p10 = scmp.lt.s32.totalorder %s1003_s9, %s781_s29 }
  0x20   : > { %p778_p11 = pnand %p776_p8, %p762_p12  ;;  %p784_p1 = scmp.lt.s32.totalorder %s782_s30, %s775_s25 }
  0x22   : > { %p779_p13 = pneg %p778_p11  ;;  %p785_p2 = por %p784_p1, %p783_p10 }
  0x24   : > { %p786_p3 = pnand %p785_p2, %p779_p13 }
  0x26   : > { %789 = shalt.err (!%p786_p3)
}
  0x27   : > { %s903_s5 = smov 2048   ;;  %s904_s6 = smov 1024  }
  0x28   : > { %s905_s8 = smov 64   ;;  %p200_p12 = scmp.lt.s32.totalorder %s900_s20, 3 }
  0x29   : > { %693 = dma.hbm_to_vmem [thread:$0]  (!%p999_p9), %s995_s7, 8192, %s1003_s9, %s1006_s11, %s903_s5, %s904_s6, %s905_s8  }
  0x2a   : > { %p1213_p0 = scmp.ge.s32.totalorder %s900_s20, 1 }
  0x2c   : > { %p201_p4 = pnand %p1213_p0, %p200_p12 }
  0x2d   : > { %s206_s12 = sand.u32 (!%p201_p4), 1, %s884_s16  }
  0x2e   : > { %204 = sbr.rel (%p201_p4) target bundleno = 830 (0x33e), region = 32  ;;  %s646_s13 = sshll.u32 (!%p201_p4), %s206_s12, 9 }
  0x2f   : > { %s207_s14 = scalar_lea.sflag (!%p201_p4), [#allocation4], %s206_s12  ;;  %s1038_s15 = scalar_lea.vmem (!%p201_p4), [#allocation3], %s646_s13 }
  0x35   : > { %867 = dma.done.wait (%p982_p7), %s207_s14, 8192  }
  0x36   : > { %869 = vsyncadd (%p982_p7), %s207_s14, 4294959104  ;;  %p647_p10 = scmp.ne.s32.totalorder %s892_s18, 0 }
  0x37   : > { %vm236_vm0 = vcmask (!%p647_p10), 254976   ;;  %v906_v0 = vmov (!%p647_p10), 0.0  }
  0x38   : > { %235 = sbr.rel (%p647_p10) target bundleno = 63 (0x3f), region = 40  ;;  %237 = vst.msk [vmem:[#allocation2] sm:$0x3] (!%p647_p10), %vm236_vm0, %v906_v0 }
  0x3f PF: > { %v271_v1 = vld [vmem:[%s1038_s15 + $0x100] sm:$0xff]  ;;  %v272_v2 = vld [vmem:[%s1038_s15 + $0x108] sm:$0xff]  ;;  %v273_v3 = vld [vmem:[%s1038_s15 + $0x110] sm:$0xff]  ;;  %vm394_vm1 = vcmask 130112   ;;  %vm401_vm2 = vcmask 195712   ;;  %vm408_vm3 = vcmask 261312  }
  0x40   : > { %v339_v4 = vadd.f32 %v272_v2, %v271_v1  ;;  %v274_v5 = vld [vmem:[%s1038_s15 + $0x118] sm:$0xff]  ;;  %v239_v6 = vld [vmem:[%s1038_s15] sm:$0xff]  ;;  %v240_v8 = vld [vmem:[%s1038_s15 + $0x8] sm:$0xff]  ;;  %vm429_vm4 = vcmask 1041409   ;;  %vm433_vm5 = vcmask 254976   ;;  %p648_p7 = scmp.ne.s32.totalorder %s892_s18, 1 }
  0x41   : > { %v241_v9 = vld [vmem:[%s1038_s15 + $0x10] sm:$0xff]  ;;  %v275_v10 = vld [vmem:[%s1038_s15 + $0x120] sm:$0xff]  ;;  %v303_v11 = vadd.f32 %v240_v8, %v239_v6  ;;  %v242_v13 = vld [vmem:[%s1038_s15 + $0x18] sm:$0xff]  ;;  %vm908_vm6 = vmmov (!%p648_p7), 0   ;;  %vm453_vm7 = vcmask (!%p648_p7), 261120   ;;  %vm527_vm8 = vcmask (!%p648_p7), 123904  }
  0x42   : > { %v340_v7 = vadd.f32 %v339_v4, %v273_v3  ;;  %v279_v14 = vld [vmem:[%s1038_s15 + $0x140] sm:$0xff]  ;;  %v280_v15 = vld [vmem:[%s1038_s15 + $0x148] sm:$0xff]  ;;  %v281_v18 = vld [vmem:[%s1038_s15 + $0x150] sm:$0xff] }
  0x43   : > { %v276_v16 = vld [vmem:[%s1038_s15 + $0x128] sm:$0xff]  ;;  %v304_v17 = vadd.f32 %v303_v11, %v241_v9  ;;  %v348_v19 = vadd.f32 %v280_v15, %v279_v14  ;;  %v277_v20 = vld [vmem:[%s1038_s15 + $0x130] sm:$0xff]  ;;  %v243_v22 = vld [vmem:[%s1038_s15 + $0x20] sm:$0xff] }
  0x44   : > { %v341_v12 = vadd.f32 %v340_v7, %v274_v5  ;;  %v282_v23 = vld [vmem:[%s1038_s15 + $0x158] sm:$0xff]  ;;  %v247_v26 = vld [vmem:[%s1038_s15 + $0x40] sm:$0xff]  ;;  %v248_v27 = vld [vmem:[%s1038_s15 + $0x48] sm:$0xff] }
  0x45   : > { %v305_v24 = vadd.f32 %v304_v17, %v242_v13  ;;  %v349_v25 = vadd.f32 %v348_v19, %v281_v18  ;;  %v249_v28 = vld [vmem:[%s1038_s15 + $0x50] sm:$0xff]  ;;  %v278_v29 = vld [vmem:[%s1038_s15 + $0x138] sm:$0xff]  ;;  %v244_v31 = vld [vmem:[%s1038_s15 + $0x28] sm:$0xff]  ;;  %v312_v33 = vadd.f32 %v248_v27, %v247_v26 }
  0x46   : > { %v342_v21 = vadd.f32 %v341_v12, %v275_v10  ;;  %v283_v32 = vld [vmem:[%s1038_s15 + $0x160] sm:$0xff]  ;;  %v245_v34 = vld [vmem:[%s1038_s15 + $0x30] sm:$0xff]  ;;  %v250_v37 = vld [vmem:[%s1038_s15 + $0x58] sm:$0xff] }
  0x47   : > { %v306_v35 = vadd.f32 %v305_v24, %v243_v22  ;;  %v350_v36 = vadd.f32 %v349_v25, %v282_v23  ;;  %v287_v38 = vld [vmem:[%s1038_s15 + $0x180] sm:$0xff]  ;;  %v284_v40 = vld [vmem:[%s1038_s15 + $0x168] sm:$0xff]  ;;  %v313_v41 = vadd.f32 %v312_v33, %v249_v28  ;;  %v289_v43 = vld [vmem:[%s1038_s15 + $0x190] sm:$0xff] }
  0x48   : > { %v343_v30 = vadd.f32 %v342_v21, %v276_v16  ;;  %v288_v42 = vld [vmem:[%s1038_s15 + $0x188] sm:$0xff]  ;;  %v246_v44 = vld [vmem:[%s1038_s15 + $0x38] sm:$0xff]  ;;  %v285_v46 = vld [vmem:[%s1038_s15 + $0x170] sm:$0xff] }
  0x49   : > { %v307_v45 = vadd.f32 %v306_v35, %v244_v31  ;;  %v351_v47 = vadd.f32 %v350_v36, %v283_v32  ;;  %v251_v48 = vld [vmem:[%s1038_s15 + $0x60] sm:$0xff]  ;;  %v357_v49 = vadd.f32 %v288_v42, %v287_v38  ;;  %v314_v51 = vadd.f32 %v313_v41, %v250_v37  ;;  %v290_v52 = vld [vmem:[%s1038_s15 + $0x198] sm:$0xff]  ;;  %v256_v54 = vld [vmem:[%s1038_s15 + $0x88] sm:$0xff] }
  0x4a   : > { %v344_v39 = vadd.f32 %v343_v30, %v277_v20  ;;  %v255_v53 = vld [vmem:[%s1038_s15 + $0x80] sm:$0xff]  ;;  %v286_v56 = vld [vmem:[%s1038_s15 + $0x178] sm:$0xff]  ;;  %v252_v58 = vld [vmem:[%s1038_s15 + $0x68] sm:$0xff] }
  0x4b   : > { %v308_v55 = vadd.f32 %v307_v45, %v245_v34  ;;  %v352_v57 = vadd.f32 %v351_v47, %v284_v40  ;;  %v358_v59 = vadd.f32 %v357_v49, %v289_v43  ;;  %v257_v60 = vld [vmem:[%s1038_s15 + $0x90] sm:$0xff]  ;;  %v321_v61 = vadd.f32 %v256_v54, %v255_v53  ;;  %v291_v0 = vld [vmem:[%s1038_s15 + $0x1a0] sm:$0xff]  ;;  %v258_v1 = vld [vmem:[%s1038_s15 + $0x98] sm:$0xff] }
  0x4c   : > { %v345_v50 = vadd.f32 %v344_v39, %v278_v29  ;;  %v253_v62 = vld [vmem:[%s1038_s15 + $0x70] sm:$0xff]  ;;  %v315_v63 = vadd.f32 %v314_v51, %v251_v48  ;;  %v295_v6 = vld [vmem:[%s1038_s15 + $0x1c0] sm:$0xff]  ;;  %v296_v7 = vld [vmem:[%s1038_s15 + $0x1c8] sm:$0xff] }
  0x4d   : > { %v309_v2 = vadd.f32 %v308_v55, %v246_v44  ;;  %v353_v3 = vadd.f32 %v352_v57, %v285_v46  ;;  %v359_v4 = vadd.f32 %v358_v59, %v290_v52  ;;  %v322_v5 = vadd.f32 %v321_v61, %v257_v60  ;;  %v297_v8 = vld [vmem:[%s1038_s15 + $0x1d0] sm:$0xff]  ;;  %v254_v9 = vld [vmem:[%s1038_s15 + $0x78] sm:$0xff]  ;;  %v292_v11 = vld [vmem:[%s1038_s15 + $0x1a8] sm:$0xff] }
  0x4e   : > { %346 = vadd.xlane.f32.xlu1 %v345_v50  ;;  %v316_v10 = vadd.f32 %v315_v63, %v252_v58  ;;  %v259_v12 = vld [vmem:[%s1038_s15 + $0xa0] sm:$0xff]  ;;  %v366_v13 = vadd.f32 %v296_v7, %v295_v6  ;;  %v293_v15 = vld [vmem:[%s1038_s15 + $0x1b0] sm:$0xff]  ;;  %v298_v18 = vld [vmem:[%s1038_s15 + $0x1d8] sm:$0xff]  ;;  %v383_v57 = vlaneseq }
  0x4f   : > { %310 = vadd.xlane.f32.xlu0 %v309_v2  ;;  %v354_v14 = vadd.f32 %v353_v3, %v286_v56  ;;  %v360_v16 = vadd.f32 %v359_v4, %v291_v0  ;;  %v323_v17 = vadd.f32 %v322_v5, %v258_v1  ;;  %v263_v19 = vld [vmem:[%s1038_s15 + $0xc0] sm:$0xff]  ;;  %v260_v21 = vld [vmem:[%s1038_s15 + $0xa8] sm:$0xff]  ;;  %v265_v24 = vld [vmem:[%s1038_s15 + $0xd0] sm:$0xff] }
  0x50   : > { %v317_v20 = vadd.f32 %v316_v10, %v253_v62  ;;  %v367_v22 = vadd.f32 %v366_v13, %v297_v8  ;;  %v264_v23 = vld [vmem:[%s1038_s15 + $0xc8] sm:$0xff]  ;;  %v299_v27 = vld [vmem:[%s1038_s15 + $0x1e0] sm:$0xff]  ;;  %v294_v30 = vld [vmem:[%s1038_s15 + $0x1b8] sm:$0xff]  ;;  %v384_v60 = vand.u32 127, %v383_v57  ;;  %v386_v0 = vshrl.u32 %v383_v57, 7 }
  0x51   : > { %v361_v25 = vadd.f32 %v360_v16, %v292_v11  ;;  %v324_v26 = vadd.f32 %v323_v17, %v259_v12  ;;  %v330_v28 = vadd.f32 %v264_v23, %v263_v19  ;;  %v261_v31 = vld [vmem:[%s1038_s15 + $0xb0] sm:$0xff]  ;;  %v266_v33 = vld [vmem:[%s1038_s15 + $0xd8] sm:$0xff]  ;;  %v300_v36 = vld [vmem:[%s1038_s15 + $0x1e8] sm:$0xff] }
  0x52   : > { %355 = vadd.xlane.f32.xlu1 %v354_v14  ;;  %v318_v29 = vadd.f32 %v317_v20, %v254_v9  ;;  %v368_v32 = vadd.f32 %v367_v22, %v298_v18  ;;  %v262_v38 = vld [vmem:[%s1038_s15 + $0xb8] sm:$0xff]  ;;  %v267_v40 = vld [vmem:[%s1038_s15 + $0xe0] sm:$0xff]  ;;  %v301_v43 = vld [vmem:[%s1038_s15 + $0x1f0] sm:$0xff]  ;;  %v389_v62 = vadd.s32 4294967288, %v384_v60  ;;  %v396_v63 = vadd.s32 4294967280, %v384_v60 }
  0x53   : > { %v362_v34 = vadd.f32 %v361_v25, %v293_v15  ;;  %v325_v35 = vadd.f32 %v324_v26, %v260_v21  ;;  %v331_v37 = vadd.f32 %v330_v28, %v265_v24  ;;  %v268_v46 = vld [vmem:[%s1038_s15 + $0xe8] sm:$0xff]  ;;  %v302_v48 = vld [vmem:[%s1038_s15 + $0x1f8] sm:$0xff]  ;;  %v269_v51 = vld [vmem:[%s1038_s15 + $0xf0] sm:$0xff]  ;;  %v403_v2 = vadd.s32 4294967272, %v384_v60 }
  0x54   : > { %319 = vadd.xlane.f32.xlu0 %v318_v29  ;;  %v369_v39 = vadd.f32 %v368_v32, %v299_v27  ;;  %v270_v54 = vld [vmem:[%s1038_s15 + $0xf8] sm:$0xff]  ;;  %v392_v3 = vsub.s32 %v389_v62, %v386_v0  ;;  %v399_v4 = vsub.s32 %v396_v63, %v386_v0  ;;  %v387_v6 = vsub.s32 %v384_v60, %v386_v0  ;;  %v443_v29 = vld [vmem:[%s1206_s1 + $0x8] sm:$0xff] (!%p648_p7) }
  0x55   : > { %v363_v41 = vadd.f32 %v362_v34, %v294_v30  ;;  %v326_v42 = vadd.f32 %v325_v35, %v261_v31  ;;  %v332_v44 = vadd.f32 %v331_v37, %v266_v33  ;;  %v406_v8 = vsub.s32 %v403_v2, %v386_v0  ;;  %v238_v24 = vld [vmem:[#allocation2] sm:$0x3]  ;;  %v444_v30 = vld [vmem:[%s1206_s1 + $0x10] sm:$0xff] (!%p648_p7)  ;;  %v445_v33 = vld [vmem:[%s1206_s1 + $0x18] sm:$0xff] (!%p648_p7) }
  0x56   : > { %v370_v45 = vadd.f32 %v369_v39, %v300_v36  ;;  %v442_v28 = vld [vmem:[%s1206_s1] sm:$0xff] (!%p648_p7)  ;;  %v907_v31 = vmov (!%p648_p7), 0.0|0.0   ;;  %v909_v34 = vmov (!%p648_p7), 0.0   ;;  %v678_v37 = vpack.c.bf16 (!%p648_p7), %v445_v33, %v444_v30 }
  0x57   : > { %364 = vadd.xlane.f32.xlu1 %v363_v41  ;;  %v327_v47 = vadd.f32 %v326_v42, %v262_v38  ;;  %v333_v49 = vadd.f32 %v332_v44, %v267_v40  ;;  %674 = vmatprep.subr.bf16.mxu0 (!%p648_p7), %v907_v31  ;;  %v675_v32 = vpack.c.bf16 (!%p648_p7), %v443_v29, %v442_v28  ;;  %v649_v38 = vld [vmem:[%s1207_s2] ss:$0 sm:$0xff] (!%p648_p7) }
  0x58   : > { %v371_v50 = vadd.f32 %v370_v45, %v301_v43  ;;  %671 = vmatprep.mubr.msk.f32.mxu0 (!%p648_p7), %vm908_vm6, %v909_v34 }
  0x59   : > { %328 = vadd.xlane.f32.xlu0 %v327_v47  ;;  %v334_v52 = vadd.f32 %v333_v49, %v268_v46  ;;  %676 = vmatpush3.bf16.msra.mxu0 (!%p648_p7), %v675_v32 }
  0x5a   : > { %v372_v53 = vadd.f32 %v371_v50, %v302_v48  ;;  %677 = vmatprep.subr.bf16.mxu0 (!%p648_p7), %v907_v31 }
  0x5b   : > { %v335_v55 = vadd.f32 %v334_v52, %v269_v51 }
  0x5c   : > { %373 = vadd.xlane.f32.xlu1 %v372_v53 }
  0x5d   : > { %v336_v56 = vadd.f32 %v335_v55, %v270_v54  ;;  %679 = vmatpush3.bf16.msra.mxu0 (!%p648_p7), %v678_v37 }
  0x5f   : > { %337 = vadd.xlane.f32.xlu0 %v336_v56 }
  0xdb   : > { %v347_v58 = vpop.xlane.xlu1 %346 }
  0xdc   : > { %v311_v59 = vpop.xlane.xlu0 %310  ;;  %v413_v11 = vrot.slane %v347_v58, %v387_v6 }
  0xdd   : > { %v388_v16 = vrot.slane %v311_v59, %v387_v6 }
  0xdf   : > { %v356_v61 = vpop.xlane.xlu1 %355 }
  0xe0   : > { %v417_v9 = vrot.slane %v356_v61, %v392_v3 }
  0xe1   : > { %v320_v1 = vpop.xlane.xlu0 %319 }
  0xe2   : > { %v393_v12 = vrot.slane %v320_v1, %v392_v3  ;;  %v418_v17 = vsel %vm394_vm1, %v417_v9, %v413_v11 }
  0xe4   : > { %v365_v5 = vpop.xlane.xlu1 %364  ;;  %v395_v20 = vsel %vm394_vm1, %v393_v12, %v388_v16 }
  0xe5   : > { %v422_v10 = vrot.slane %v365_v5, %v399_v4 }
  0xe6   : > { %v329_v7 = vpop.xlane.xlu0 %328 }
  0xe7   : > { %v400_v14 = vrot.slane %v329_v7, %v399_v4  ;;  %v423_v18 = vsel %vm401_vm2, %v422_v10, %v418_v17 }
  0xe9   : > { %v374_v13 = vpop.xlane.xlu1 %373  ;;  %v402_v23 = vsel %vm401_vm2, %v400_v14, %v395_v20 }
  0xea   : > { %v427_v15 = vrot.slane %v374_v13, %v406_v8 }
  0xec   : > { %v338_v19 = vpop.xlane.xlu0 %337  ;;  %v428_v21 = vsel %vm408_vm3, %v427_v15, %v423_v18 }
  0xed   : > { %v407_v22 = vrot.slane %v338_v19, %v406_v8  ;;  %438 = sbr.rel (%p648_p7) target bundleno = 782 (0x30e), region = 44 }
  0xef   : > { %v409_v25 = vsel %vm408_vm3, %v407_v22, %v402_v23 }
  0xf0   : > { %v430_v26 = vsel %vm429_vm4, %v428_v21, %v409_v25 }
  0xf1   : > { %v432_v27 = vadd.f32 %v430_v26, %v238_v24 }
  0xf3   : > { %434 = vst.msk [vmem:[#allocation2] sm:$0x3] %vm433_vm5, %v432_v27 }
  0xfa   : > { %v439_v35 = vld [vmem:[#allocation2] sm:$0x3] }
  0xfb   : > { %v440_v36 = vmul.f32 0.00048828125, %v439_v35 }
  0xfd   : > { %441 = vst.msk [vmem:[#allocation7] sm:$0x3] %vm433_vm5, %v440_v36  ;;  %672 = vmatmul.mubr.msk.f32.vlgmr.msra.gmra.mrb[0].mxu0 %vm453_vm7, %v440_v36 }
 0x1d0   : > { %v523_v39 = vpop.f32.mrb[0].mxu0 }
 0x1d1   : > { %v524_v40 = vadd.f32 %v649_v38, %v523_v39  ;;  %v673_v41 = vpop.f32.mrb[1].mxu0 }
 0x1d3   : > { %v528_v42 = vsel %vm527_vm8, %v524_v40, -inf }
 0x1d4   : > { %529 = vmax.xlane.f32.xlu0 %v528_v42 }
 0x261   : > { %v530_v43 = vpop.xlane.xlu0 %529 }
 0x262   : > { %v531_v44 = vsub.f32 %v524_v40, %v530_v43 }
 0x264   : > { %v532_v45 = vmul.f32 1.442695, %v531_v44 }
 0x266   : > { %756 = vpow2.f32 %v532_v45 }
 0x270   : > { %v757_v46 = vpop.eup %756 }
 0x271   : > { %v534_v47 = vsel %vm527_vm8, %v757_v46, 0.0 }
 0x272   : > { %535 = vadd.xlane.f32.xlu0 %v534_v47 }
 0x2ff   : > { %v536_v48 = vpop.xlane.xlu0 %535 }
 0x300   : > { %758 = vrcp.f32 %v536_v48 }
 0x30a   : > { %v759_v49 = vpop.eup %758 }
 0x30b   : > { %v538_v50 = vmul.f32 %v759_v49, %v757_v46 }
 0x30d   : > { %539 = vst.msk [vmem:[#allocation6] sm:$0x3] %vm527_vm8, %v538_v50 }
 0x30e PF: > { %p1132_p9 = scmp.eq.s32.totalorder %s639_s21, 1  ;;  %s910_s30 = smov [#allocation6]  }
 0x30f   : > { %s549_s5 = sshll.u32 %s910_s30, 4  ;;  %s911_s6 = smov [#allocation7]   ;;  %s550_s5 = int_to_ptr.vmem [resolvable:$true] %s549_s5 }
 0x310   : > { %s562_s8 = sshll.u32 %s911_s6, 4  ;;  %s790_s12 = scalar_lea.vmem %s550_s5, 32  ;;  %s1136_s8 = int_to_ptr.vmem [resolvable:$true] %s562_s8 }
 0x311   : > { %p791_p5 = scmp.ne.s32.totalorder %s550_s5, %s790_s12  ;;  %p797_p11 = scmp.lt.s32.totalorder %s550_s5, %s550_s5 }
 0x312   : > { %p798_p13 = scmp.lt.s32.totalorder %s790_s12, %s790_s12 }
 0x313   : > { %p792_p6 = pnand %p791_p5, %p1132_p9 }
 0x314   : > { %p799_p1 = por %p798_p13, %p797_p11 }
 0x315   : > { %p793_p8 = pneg %p792_p6 }
 0x317   : > { %p800_p2 = pnand %p799_p1, %p793_p8 }
 0x319   : > { %803 = shalt.err (!%p800_p2)
}
 0x31a   : > { %s804_s14 = scalar_lea.hbm %s1208_s3, 32 }
 0x31b   : > { %p805_p3 = scmp.ne.s32.totalorder %s1208_s3, %s804_s14  ;;  %p810_p4 = scmp.lt.u32.totalorder %s804_s14, %s1208_s3 }
 0x31d   : > { %p806_p12 = pnand %p805_p3, %p1132_p9 }
 0x31f   : > { %p807_p0 = pneg %p806_p12 }
 0x321   : > { %p812_p10 = pnand %p810_p4, %p807_p0 }
 0x323   : > { %815 = shalt.err (!%p812_p10)
}
 0x324   : > { %683 = dma.vmem_to_hbm [thread:$0]  (%p1132_p9), %s550_s5, 32, %s1208_s3, [#allocation5]  }
 0x325   : > { %s816_s23 = scalar_lea.vmem %s1136_s8, 32  ;;  %p823_p8 = scmp.lt.s32.totalorder %s1136_s8, %s1136_s8 }
 0x326   : > { %p817_p7 = scmp.ne.s32.totalorder %s1136_s8, %s816_s23  ;;  %p824_p11 = scmp.lt.s32.totalorder %s816_s23, %s816_s23 }
 0x328   : > { %p818_p5 = pnand %p817_p7, %p1132_p9  ;;  %p825_p13 = por %p824_p11, %p823_p8 }
 0x32a   : > { %p819_p6 = pneg %p818_p5 }
 0x32c   : > { %p826_p1 = pnand %p825_p13, %p819_p6 }
 0x32e   : > { %829 = shalt.err (!%p826_p1)
}
 0x32f   : > { %s830_s18 = scalar_lea.hbm %s1209_s4, 32 }
 0x330   : > { %p831_p2 = scmp.ne.s32.totalorder %s1209_s4, %s830_s18  ;;  %p836_p0 = scmp.lt.u32.totalorder %s830_s18, %s1209_s4 }
 0x332   : > { %p832_p3 = pnand %p831_p2, %p1132_p9 }
 0x334   : > { %p833_p12 = pneg %p832_p3 }
 0x336   : > { %p838_p4 = pnand %p836_p0, %p833_p12 }
 0x338   : > { %841 = shalt.err (!%p838_p4)
}
 0x339   : > { %685 = dma.vmem_to_hbm [thread:$0]  (%p1132_p9), %s1136_s8, 32, %s1209_s4, [#allocation8]  }
 0x33a   : > { %871 = dma.done.wait (%p1132_p9), [#allocation5], 32  }
 0x33b   : > { %873 = vsyncadd (%p1132_p9), [#allocation5], 4294967264 }
 0x33c   : > { %875 = dma.done.wait (%p1132_p9), [#allocation8], 32  }
 0x33d   : > { %877 = vsyncadd (%p1132_p9), [#allocation8], 4294967264 }
 0x33e PF: > { %s20_s20 = sadd.s32 1, %s900_s20   ;;  %s1215_s15 = smov %s884_s16 }
 0x33f   : > { %p17_p10 = scmp.ge.s32.totalorder %s20_s20, 4   ;;  %s1216_s16 = smov %s888_s17 }
 0x340   : > { %s1217_s17 = smov %s988_s27  ;;  %s1218_s18 = smov %s896_s19 }
 0x341   : > { %s1219_s19 = smov %s1221_s22  ;;  %19 = sbr.rel (!%p17_p10) target bundleno = 6 (0x6), region = 87 }
 0x348   :  { %579 = vsyncpa [#allocation4], 1 }
 0x349   :  { %581 = vsyncpa [#allocation4 + $0x1], 1 }
 0x34a   :  { %582 = vsyncpa [#allocation5], 1 }
 0x34b   :  { %584 = vsyncpa [#allocation5 + $0x1], 1 }
 0x34c   :  { %585 = vsyncpa [#allocation8], 1 }

</bundles_post_ra>
